<compile_context>
chip_gen: v7x
topology: tpu7x:2x2x1
jax: 0.10.0
libtpu: 0.0.40
codegen_flags: <defaults>
</compile_context>

<pallas_src>
import jax
import jax.numpy as jnp
from jax.experimental import pallas as pl
from jax.experimental.pallas import tpu as pltpu


def _round_up(x, m):
    return (x + m - 1) // m * m


def _autoencoder_kernel(x_ref, w1_ref, b1_ref, w2_ref, b2_ref, o_ref):
    # x_ref:  [TB, D]    activation tile (streams per batch tile)
    # w1_ref: [D, HID]   bf16 encoder weight (VMEM-resident across grid steps)
    # b1_ref: [1, HID]   f32 encoder bias   (resident)
    # w2_ref: [HID, D]   bf16 decoder weight (resident)
    # b2_ref: [1, D]     f32 decoder bias   (resident)
    # o_ref:  [TB, D]
    x = x_ref[...].astype(jnp.bfloat16)

    # encoder: Linear + ReLU  (bf16 MXU inputs, f32 accumulation)
    z = jnp.dot(x, w1_ref[...], preferred_element_type=jnp.float32) + b1_ref[...]
    z = jnp.maximum(z, 0.0)

    # decoder: Linear + Sigmoid
    y = jnp.dot(z.astype(jnp.bfloat16), w2_ref[...],
                preferred_element_type=jnp.float32) + b2_ref[...]

    # sigmoid = 1 / (1 + exp(-y)); exp and the approximate reciprocal both run
    # on the EUP slot -> nearly free relative to the VALU path.
    o_ref[...] = pl.reciprocal(1.0 + jnp.exp(-y), approx=True).astype(o_ref.dtype)


def prepare_params(w1, b1, w2, b2):
    """One-time parameter preparation, hoisted out of the per-call hot path.

    PyTorch nn.Linear stores weights as [out_features, in_features]; we
    transpose ONCE to [in, out] and downcast to bf16 so the kernel streams
    half the weight bytes.  Biases stay in f32.
    """
    HID, D = w1.shape
    return dict(
        w1t=jnp.asarray(w1.T, dtype=jnp.bfloat16),                 # [D, HID]
        b1=jnp.asarray(b1, dtype=jnp.float32).reshape(1, HID),     # [1, HID]
        w2t=jnp.asarray(w2.T, dtype=jnp.bfloat16),                 # [HID, D]
        b2=jnp.asarray(b2, dtype=jnp.float32).reshape(1, D),       # [1, D]
    )


@jax.jit
def autoencoder_forward(x_nchw, params):
    """x_nchw: [B, C, H, W] f32; params: output of prepare_params()."""
    B, C, H, W = x_nchw.shape
    D = C * H * W
    w1t, b1, w2t, b2 = params["w1t"], params["b1"], params["w2t"], params["b2"]
    HID = w1t.shape[1]

    x_flat = x_nchw.reshape(B, D)              # nn.Flatten (row-major, as in PyTorch)

    # Batch tile: at least the f32 sublane (8); 128 rows once real batches exist.
    tile_b = 128 if B >= 128 else _round_up(B, 8)
    padded_b = _round_up(B, tile_b)
    if padded_b != B:
        x_flat = jnp.pad(x_flat, ((0, padded_b - B), (0, 0)))
    num_tiles = padded_b // tile_b

    itemsize = x_flat.dtype.itemsize
    cost = pl.CostEstimate(
        flops=4 * padded_b * D * HID,                    # two matmuls
        transcendentals=padded_b * D,                    # sigmoid exp
        bytes_accessed=(2 * padded_b * D * itemsize      # x + out
                        + 2 * D * HID * 2                # bf16 weights
                        + (HID + D) * 4),                # f32 biases
    )

    # VMEM budget: resident weights + biases + double-buffered x/out tiles.
    vmem_needed = (2 * D * HID * 2 + (HID + D) * 4
                   + 2 * 2 * tile_b * D * itemsize)
    vmem_limit = int(min(max(2 * vmem_needed, 8 << 20), 48 << 20))

    out_flat = pl.pallas_call(
        _autoencoder_kernel,
        out_shape=jax.ShapeDtypeStruct((padded_b, D), x_nchw.dtype),
        grid=(num_tiles,),
        in_specs=[
            pl.BlockSpec((tile_b, D), lambda i: (i, 0)),   # x: streams per batch tile
            pl.BlockSpec((D, HID), lambda i: (0, 0)),      # w1t: resident (index ignores i)
            pl.BlockSpec((1, HID), lambda i: (0, 0)),      # b1: resident
            pl.BlockSpec((HID, D), lambda i: (0, 0)),      # w2t: resident
            pl.BlockSpec((1, D), lambda i: (0, 0)),        # b2: resident
        ],
        out_specs=pl.BlockSpec((tile_b, D), lambda i: (i, 0)),   # lane-dense on D
        compiler_params=pltpu.CompilerParams(
            dimension_semantics=("parallel",),   # v7x: shard batch tiles across both TCs
            vmem_limit_bytes=vmem_limit,
        ),
        cost_estimate=cost,
    )(x_flat, w1t, b1, w2t, b2)

    return out_flat[:B].reshape(B, C, H, W)


def _reference_forward(x_nchw, w1, b1, w2, b2):
    # Pure-JAX f32 reference mirroring the PyTorch semantics.
    B, C, H, W = x_nchw.shape
    x = x_nchw.reshape(B, -1)
    z = jnp.maximum(x @ w1.T + b1, 0.0)
    y = jax.nn.sigmoid(z @ w2.T + b2)
    return y.reshape(B, C, H, W)


if __name__ == "__main__":
    # Small deterministic shapes consistent with an autoencoder forward pass.
    B, C, H, W = 2, 4, 16, 16
    D = C * H * W          # 1024
    HID = 32

    key = jax.random.PRNGKey(0)
    kx, k1, k2, k3, k4 = jax.random.split(key, 5)

    x = jax.random.normal(kx, (B, C, H, W), dtype=jnp.float32)
    # PyTorch nn.Linear layout: [out_features, in_features].
    w1 = jax.random.normal(k1, (HID, D), dtype=jnp.float32) * 0.02
    b1 = jax.random.normal(k2, (HID,), dtype=jnp.float32) * 0.02
    w2 = jax.random.normal(k3, (D, HID), dtype=jnp.float32) * 0.02
    b2 = jax.random.normal(k4, (D,), dtype=jnp.float32) * 0.02

    params = prepare_params(w1, b1, w2, b2)   # one-time; not in the hot path
    out = autoencoder_forward(x, params)
    jax.block_until_ready(out)

    ref = _reference_forward(x, w1, b1, w2, b2)
    assert out.shape == (B, C, H, W)
    # bf16 weights / bf16 MXU inputs (f32 accumulate) -> loosened tolerance.
    max_err = float(jnp.max(jnp.abs(out - ref)))
    assert jnp.allclose(out, ref, atol=1e-2, rtol=1e-2), max_err

    print("KERNEL_OK")
</pallas_src>

<mosaic_0001>
module attributes {stable_mosaic.version = 11 : i64} {
  func.func @_autoencoder_kernel(%arg0: i32, %arg1: memref<8x1024xf32, #tpu.memory_space<vmem>>, %arg2: memref<1024x32xbf16, #tpu.memory_space<vmem>>, %arg3: memref<1x32xf32, #tpu.memory_space<vmem>>, %arg4: memref<32x1024xbf16, #tpu.memory_space<vmem>>, %arg5: memref<1x1024xf32, #tpu.memory_space<vmem>>, %arg6: memref<8x1024xf32, #tpu.memory_space<vmem>>) attributes {dimension_semantics = [#tpu.dimension_semantics<parallel>], iteration_bounds = array<i64: 1>, scalar_prefetch = 0 : i64, scratch_operands = 0 : i64, tpu.core_type = #tpu.core_type<tc>, window_params = [{transform_indices = @transform_0, window_bounds = array<i64: 8, 1024>}, {pipeline_mode = #tpu.pipeline_mode<synchronous>, transform_indices = @transform_1, window_bounds = array<i64: 1024, 32>}, {pipeline_mode = #tpu.pipeline_mode<synchronous>, transform_indices = @transform_2, window_bounds = array<i64: 1, 32>}, {pipeline_mode = #tpu.pipeline_mode<synchronous>, transform_indices = @transform_3, window_bounds = array<i64: 32, 1024>}, {pipeline_mode = #tpu.pipeline_mode<synchronous>, transform_indices = @transform_4, window_bounds = array<i64: 1, 1024>}, {transform_indices = @transform_5, window_bounds = array<i64: 8, 1024>}]} {
    %c0 = arith.constant 0 : index
    %c0_0 = arith.constant 0 : index
    %0 = vector.load %arg1[%c0, %c0_0] : memref<8x1024xf32, #tpu.memory_space<vmem>>, vector<8x1024xf32>
    %1 = arith.truncf %0 : vector<8x1024xf32> to vector<8x1024xbf16>
    %c0_1 = arith.constant 0 : index
    %c0_2 = arith.constant 0 : index
    %2 = vector.load %arg2[%c0_1, %c0_2] : memref<1024x32xbf16, #tpu.memory_space<vmem>>, vector<1024x32xbf16>
    %cst = arith.constant dense<0.000000e+00> : vector<8x32xf32>
    %3 = tpu.matmul %1, %2, %cst {dimension_numbers = #tpu.dot_dimension_numbers<[1], [0], [0], [1], [0, 0, 1, 1], [], []>} : vector<8x1024xbf16>, vector<1024x32xbf16>, vector<8x32xf32> -> vector<8x32xf32>
    %c0_3 = arith.constant 0 : index
    %c0_4 = arith.constant 0 : index
    %4 = vector.load %arg3[%c0_3, %c0_4] : memref<1x32xf32, #tpu.memory_space<vmem>>, vector<1x32xf32>
    %5 = vector.broadcast %4 : vector<1x32xf32> to vector<8x32xf32>
    %6 = arith.addf %3, %5 : vector<8x32xf32>
    %cst_5 = arith.constant 0.000000e+00 : f32
    %7 = vector.broadcast %cst_5 : f32 to vector<8x32xf32>
    %8 = arith.maximumf %6, %7 : vector<8x32xf32>
    %9 = arith.truncf %8 : vector<8x32xf32> to vector<8x32xbf16>
    %c0_6 = arith.constant 0 : index
    %c0_7 = arith.constant 0 : index
    %10 = vector.load %arg4[%c0_6, %c0_7] : memref<32x1024xbf16, #tpu.memory_space<vmem>>, vector<32x1024xbf16>
    %cst_8 = arith.constant dense<0.000000e+00> : vector<8x1024xf32>
    %11 = tpu.matmul %9, %10, %cst_8 {dimension_numbers = #tpu.dot_dimension_numbers<[1], [0], [0], [1], [0, 0, 1, 1], [], []>} : vector<8x32xbf16>, vector<32x1024xbf16>, vector<8x1024xf32> -> vector<8x1024xf32>
    %c0_9 = arith.constant 0 : index
    %c0_10 = arith.constant 0 : index
    %12 = vector.load %arg5[%c0_9, %c0_10] : memref<1x1024xf32, #tpu.memory_space<vmem>>, vector<1x1024xf32>
    %13 = vector.broadcast %12 : vector<1x1024xf32> to vector<8x1024xf32>
    %14 = arith.addf %11, %13 : vector<8x1024xf32>
    %cst_11 = arith.constant 0.000000e+00 : f32
    %15 = vector.broadcast %cst_11 : f32 to vector<8x1024xf32>
    %16 = arith.subf %15, %14 : vector<8x1024xf32>
    %17 = math.exp %16 : vector<8x1024xf32>
    %cst_12 = arith.constant 1.000000e+00 : f32
    %18 = vector.broadcast %cst_12 : f32 to vector<8x1024xf32>
    %19 = arith.addf %18, %17 : vector<8x1024xf32>
    %20 = tpu.reciprocal %19 {approx = true} : vector<8x1024xf32> -> vector<8x1024xf32>
    %c0_13 = arith.constant 0 : index
    %c0_14 = arith.constant 0 : index
    %21 = vector.load %arg6[%c0_13, %c0_14] : memref<8x1024xf32, #tpu.memory_space<vmem>>, vector<8x1024xf32>
    tpu.vector_store %arg6[%c0_13, %c0_14], %20 {strides = array<i32>} : memref<8x1024xf32, #tpu.memory_space<vmem>>, vector<8x1024xf32>,
    return
  }
  func.func @transform_0(%arg0: i32) -> (i32, i32) {
    %c0_i32 = arith.constant 0 : i32
    %c0_i32_0 = arith.constant 0 : i32
    return %arg0, %c0_i32 : i32, i32
  }
  func.func @transform_1(%arg0: i32) -> (i32, i32) {
    %c0_i32 = arith.constant 0 : i32
    %c0_i32_0 = arith.constant 0 : i32
    %c0_i32_1 = arith.constant 0 : i32
    return %c0_i32, %c0_i32_0 : i32, i32
  }
  func.func @transform_2(%arg0: i32) -> (i32, i32) {
    %c0_i32 = arith.constant 0 : i32
    %c0_i32_0 = arith.constant 0 : i32
    %c0_i32_1 = arith.constant 0 : i32
    return %c0_i32, %c0_i32_0 : i32, i32
  }
  func.func @transform_3(%arg0: i32) -> (i32, i32) {
    %c0_i32 = arith.constant 0 : i32
    %c0_i32_0 = arith.constant 0 : i32
    %c0_i32_1 = arith.constant 0 : i32
    return %c0_i32, %c0_i32_0 : i32, i32
  }
  func.func @transform_4(%arg0: i32) -> (i32, i32) {
    %c0_i32 = arith.constant 0 : i32
    %c0_i32_0 = arith.constant 0 : i32
    %c0_i32_1 = arith.constant 0 : i32
    return %c0_i32, %c0_i32_0 : i32, i32
  }
  func.func @transform_5(%arg0: i32) -> (i32, i32) {
    %c0_i32 = arith.constant 0 : i32
    %c0_i32_0 = arith.constant 0 : i32
    return %arg0, %c0_i32 : i32, i32
  }
}

</mosaic_0001>

<bundles_post_ra>
// kernel: autoencoder_forward.1
= control target key start
LH: loop header
LB: loop body
LE: loop exit
PB: predicated region body
PF: predicated region fallthrough
CT: control target
= control target key end

     0   :  { %vm856_vm0 = vcmask 261120   ;;  %s1675_s1 = inlined_call_operand.vmem [shape: bf16[1024,32], index: 1, kind: input, shape index: {}]   ;;  %s1676_s0 = inlined_call_operand.vmem [shape: f32[8,1024], index: 0, kind: input, shape index: {}]   ;;  %s1677_s3 = inlined_call_operand.vmem [shape: bf16[32,1024], index: 3, kind: input, shape index: {}]   ;;  %s1678_s2 = inlined_call_operand.vmem [shape: f32[1,32], index: 2, kind: input, shape index: {}]   ;;  %s1679_s4 = inlined_call_operand.vmem [shape: f32[1,1024], index: 4, kind: input, shape index: {}]   ;;  %s1680_s5 = inlined_call_operand.vmem [shape: f32[8,1024], index: 5, kind: output, shape index: {}]  }
   0x1   :  { %v1250_v0 = vld [vmem:[%s1675_s1 + $0x40] sm:$0xff]   ;;  %v1254_v4 = vld [vmem:[%s1675_s1 + $0x48] sm:$0xff]   ;;  %v1258_v8 = vld [vmem:[%s1675_s1 + $0x50] sm:$0xff]  }
   0x2   :  { %v1251_v1 = vld [vmem:[%s1675_s1 + $0xc0] sm:$0xff]   ;;  %1161 = vmatprep.subr.bf16.mxu0 %v1250_v0  ;;  %v1255_v5 = vld [vmem:[%s1675_s1 + $0xc8] sm:$0xff]   ;;  %v1259_v9 = vld [vmem:[%s1675_s1 + $0xd0] sm:$0xff]  }
   0x3   :  { %v1252_v2 = vld [vmem:[%s1675_s1] sm:$0xff]   ;;  %1183 = vmatprep.subr.bf16.mxu1 %v1251_v1  ;;  %v1256_v6 = vld [vmem:[%s1675_s1 + $0x8] sm:$0xff]   ;;  %v1260_v10 = vld [vmem:[%s1675_s1 + $0x10] sm:$0xff]  }
   0x4   :  { %v1253_v3 = vld [vmem:[%s1675_s1 + $0x80] sm:$0xff]   ;;  %1162 = vmatpush3.bf16.msra.mxu0 %v1252_v2  ;;  %v1257_v7 = vld [vmem:[%s1675_s1 + $0x88] sm:$0xff]   ;;  %v1261_v11 = vld [vmem:[%s1675_s1 + $0x90] sm:$0xff]  }
   0x5   :  { %1184 = vmatpush3.bf16.msra.mxu1 %v1253_v3  ;;  %1163 = vmatprep.subr.bf16.mxu0 %v1254_v4  ;;  %v1262_v12 = vld [vmem:[%s1675_s1 + $0x58] sm:$0xff]   ;;  %v1266_v16 = vld [vmem:[%s1675_s1 + $0x60] sm:$0xff]   ;;  %v1270_v20 = vld [vmem:[%s1675_s1 + $0x68] sm:$0xff]  }
   0x6   :  { %1185 = vmatprep.subr.bf16.mxu1 %v1255_v5  ;;  %v1263_v13 = vld [vmem:[%s1675_s1 + $0xd8] sm:$0xff]   ;;  %v1267_v17 = vld [vmem:[%s1675_s1 + $0xe0] sm:$0xff]   ;;  %v1271_v21 = vld [vmem:[%s1675_s1 + $0xe8] sm:$0xff]  }
   0x7   :  { %v1264_v14 = vld [vmem:[%s1675_s1 + $0x18] sm:$0xff]   ;;  %v1268_v18 = vld [vmem:[%s1675_s1 + $0x20] sm:$0xff]   ;;  %v1272_v22 = vld [vmem:[%s1675_s1 + $0x28] sm:$0xff]  }
   0x8   :  { %1164 = vmatpush3.bf16.msra.mxu0 %v1256_v6  ;;  %v1265_v15 = vld [vmem:[%s1675_s1 + $0x98] sm:$0xff]   ;;  %v1269_v19 = vld [vmem:[%s1675_s1 + $0xa0] sm:$0xff]   ;;  %v1273_v23 = vld [vmem:[%s1675_s1 + $0xa8] sm:$0xff]  }
   0x9   :  { %1186 = vmatpush3.bf16.msra.mxu1 %v1257_v7  ;;  %1165 = vmatprep.subr.bf16.mxu0 %v1258_v8  ;;  %v1274_v24 = vld [vmem:[%s1675_s1 + $0x70] sm:$0xff]   ;;  %v1278_v28 = vld [vmem:[%s1675_s1 + $0x78] sm:$0xff]   ;;  %v22_v32 = vld [vmem:[%s1676_s0 + $0x8] sm:$0xff] }
   0xa   :  { %1187 = vmatprep.subr.bf16.mxu1 %v1259_v9  ;;  %v1275_v25 = vld [vmem:[%s1675_s1 + $0xf0] sm:$0xff]   ;;  %v1279_v29 = vld [vmem:[%s1675_s1 + $0xf8] sm:$0xff]   ;;  %v21_v34 = vld [vmem:[%s1676_s0] sm:$0xff]  ;;  %v30_v35 = vpack.c.bf16 %v22_v32, %v22_v32 }
   0xb   :  { %v1276_v26 = vld [vmem:[%s1675_s1 + $0x30] sm:$0xff]   ;;  %v1280_v30 = vld [vmem:[%s1675_s1 + $0x38] sm:$0xff]   ;;  %v29_v37 = vpack.c.bf16 %v21_v34, %v21_v34  ;;  %v1282_v40 = vld [vmem:[%s1675_s1 + $0x140] sm:$0xff]  }
   0xc   :  { %1166 = vmatpush3.bf16.msra.mxu0 %v1260_v10  ;;  %v1277_v27 = vld [vmem:[%s1675_s1 + $0xb0] sm:$0xff]   ;;  %v1281_v31 = vld [vmem:[%s1675_s1 + $0xb8] sm:$0xff]   ;;  %588 = vmatprep.mubr.bf16.mxu0 %v30_v35  ;;  %v1283_v41 = vld [vmem:[%s1675_s1 + $0x1c0] sm:$0xff]   ;;  %v1346_v35 = vmov 0  }
   0xd   :  { %1188 = vmatpush3.bf16.msra.mxu1 %v1261_v11  ;;  %1167 = vmatprep.subr.bf16.mxu0 %v1262_v12  ;;  %v24_v33 = vld [vmem:[%s1676_s0 + $0x18] sm:$0xff]  ;;  %v23_v38 = vld [vmem:[%s1676_s0 + $0x10] sm:$0xff]  ;;  %v1284_v42 = vld [vmem:[%s1675_s1 + $0x100] sm:$0xff]  }
   0xe   :  { %1189 = vmatprep.subr.bf16.mxu1 %v1263_v13  ;;  %v32_v36 = vpack.c.bf16 %v24_v33, %v24_v33  ;;  %v31_v39 = vpack.c.bf16 %v23_v38, %v23_v38  ;;  %v1285_v43 = vld [vmem:[%s1675_s1 + $0x180] sm:$0xff]   ;;  %v1286_v44 = vld [vmem:[%s1675_s1 + $0x148] sm:$0xff]   ;;  %v1290_v48 = vld [vmem:[%s1675_s1 + $0x150] sm:$0xff]  }
   0xf   :  { %v1287_v45 = vld [vmem:[%s1675_s1 + $0x1c8] sm:$0xff]   ;;  %v1291_v49 = vld [vmem:[%s1675_s1 + $0x1d0] sm:$0xff]   ;;  %v1294_v52 = vld [vmem:[%s1675_s1 + $0x158] sm:$0xff]  }
  0x10   :  { %1168 = vmatpush3.bf16.msra.mxu0 %v1264_v14  ;;  %628 = vmatprep.mubr.bf16.mxu1 %v32_v36  ;;  %v1288_v46 = vld [vmem:[%s1675_s1 + $0x108] sm:$0xff]   ;;  %v1292_v50 = vld [vmem:[%s1675_s1 + $0x110] sm:$0xff]   ;;  %v1295_v53 = vld [vmem:[%s1675_s1 + $0x1d8] sm:$0xff]  }
  0x11   :  { %1190 = vmatpush3.bf16.msra.mxu1 %v1265_v15  ;;  %1169 = vmatprep.subr.bf16.mxu0 %v1266_v16  ;;  %v1289_v47 = vld [vmem:[%s1675_s1 + $0x188] sm:$0xff]   ;;  %v1293_v51 = vld [vmem:[%s1675_s1 + $0x190] sm:$0xff]   ;;  %v1296_v54 = vld [vmem:[%s1675_s1 + $0x118] sm:$0xff]  }
  0x12   :  { %1191 = vmatprep.subr.bf16.mxu1 %v1267_v17  ;;  %v1297_v55 = vld [vmem:[%s1675_s1 + $0x198] sm:$0xff]   ;;  %v1298_v56 = vld [vmem:[%s1675_s1 + $0x160] sm:$0xff]   ;;  %v1302_v60 = vld [vmem:[%s1675_s1 + $0x168] sm:$0xff]  }
  0x13   :  { %v1299_v57 = vld [vmem:[%s1675_s1 + $0x1e0] sm:$0xff]   ;;  %v1303_v61 = vld [vmem:[%s1675_s1 + $0x1e8] sm:$0xff]   ;;  %v1306_v0 = vld [vmem:[%s1675_s1 + $0x170] sm:$0xff]  }
  0x14   :  { %1170 = vmatpush3.bf16.msra.mxu0 %v1268_v18  ;;  %v1300_v58 = vld [vmem:[%s1675_s1 + $0x120] sm:$0xff]   ;;  %v1304_v62 = vld [vmem:[%s1675_s1 + $0x128] sm:$0xff]   ;;  %v1307_v1 = vld [vmem:[%s1675_s1 + $0x1f0] sm:$0xff]  }
  0x15   :  { %1192 = vmatpush3.bf16.msra.mxu1 %v1269_v19  ;;  %1171 = vmatprep.subr.bf16.mxu0 %v1270_v20  ;;  %v1301_v59 = vld [vmem:[%s1675_s1 + $0x1a0] sm:$0xff]   ;;  %v1305_v63 = vld [vmem:[%s1675_s1 + $0x1a8] sm:$0xff]   ;;  %v1308_v2 = vld [vmem:[%s1675_s1 + $0x130] sm:$0xff]  }
  0x16   :  { %1193 = vmatprep.subr.bf16.mxu1 %v1271_v21  ;;  %v1309_v3 = vld [vmem:[%s1675_s1 + $0x1b0] sm:$0xff]   ;;  %v1310_v4 = vld [vmem:[%s1675_s1 + $0x178] sm:$0xff]   ;;  %v26_v8 = vld [vmem:[%s1676_s0 + $0x28] sm:$0xff] }
  0x17   :  { %v1311_v5 = vld [vmem:[%s1675_s1 + $0x1f8] sm:$0xff]   ;;  %v34_v10 = vpack.c.bf16 %v26_v8, %v26_v8  ;;  %v25_v12 = vld [vmem:[%s1676_s0 + $0x20] sm:$0xff]  ;;  %v27_v13 = vld [vmem:[%s1676_s0 + $0x30] sm:$0xff] }
  0x18   :  { %1172 = vmatpush3.bf16.msra.mxu0 %v1272_v22  ;;  %v1312_v6 = vld [vmem:[%s1675_s1 + $0x138] sm:$0xff]   ;;  %v33_v14 = vpack.c.bf16 %v25_v12, %v25_v12  ;;  %v35_v15 = vpack.c.bf16 %v27_v13, %v27_v13  ;;  %v718_v16 = vld [vmem:[%s1677_s3] sm:$0xff]  ;;  %v719_v18 = vld [vmem:[%s1677_s3 + $0x8] sm:$0xff]  ;;  %v736_v12 = vlaneseq }
  0x19   :  { %1194 = vmatpush3.bf16.msra.mxu1 %v1273_v23  ;;  %1173 = vmatprep.subr.bf16.mxu0 %v1274_v24  ;;  %v1313_v7 = vld [vmem:[%s1675_s1 + $0x1b8] sm:$0xff]   ;;  %v722_v17 = vld [vmem:[%s1677_s3 + $0x20] sm:$0xff]  ;;  %v723_v20 = vld [vmem:[%s1677_s3 + $0x28] sm:$0xff] }
  0x1a   :  { %1195 = vmatprep.subr.bf16.mxu1 %v1275_v25  ;;  %v28_v9 = vld [vmem:[%s1676_s0 + $0x38] sm:$0xff]  ;;  %v1142_v19 = vcombine.high %v718_v16, %v722_v17  ;;  %v1141_v21 = vcombine.low %v718_v16, %v722_v17  ;;  %v1143_v22 = vcombine.low %v719_v18, %v723_v20  ;;  %v1144_v23 = vcombine.high %v719_v18, %v723_v20  ;;  %v726_v24 = vld [vmem:[%s1677_s3 + $0x40] sm:$0xff]  ;;  %v720_v32 = vld [vmem:[%s1677_s3 + $0x10] sm:$0xff] }
  0x1b   :  { %v36_v11 = vpack.c.bf16 %v28_v9, %v28_v9  ;;  %v730_v25 = vld [vmem:[%s1677_s3 + $0x60] sm:$0xff]  ;;  %v724_v33 = vld [vmem:[%s1677_s3 + $0x30] sm:$0xff]  ;;  %v721_v34 = vld [vmem:[%s1677_s3 + $0x18] sm:$0xff]  ;;  %v737_v13 = vshrl.u32 %v736_v12, 7 }
  0x1c   :  { %1174 = vmatpush3.bf16.msra.mxu0 %v1276_v26  ;;  %v727_v26 = vld [vmem:[%s1677_s3 + $0x48] sm:$0xff]  ;;  %v1145_v36 = vcombine.low %v720_v32, %v724_v33  ;;  %v725_v38 = vld [vmem:[%s1677_s3 + $0x38] sm:$0xff]  ;;  %v734_v16 = vld [vmem:[%s1679_s4] sm:$0xff] }
  0x1d   :  { %1196 = vmatpush3.bf16.msra.mxu1 %v1277_v27  ;;  %1175 = vmatprep.subr.bf16.mxu0 %v1278_v28  ;;  %v1150_v27 = vcombine.high %v726_v24, %v730_v25  ;;  %v731_v28 = vld [vmem:[%s1677_s3 + $0x68] sm:$0xff]  ;;  %v742_v17 = vsub.s32 1, %v737_v13  ;;  %v750_v18 = vsub.s32 3, %v737_v13 }
  0x1e   :  { %1197 = vmatprep.subr.bf16.mxu1 %v1279_v29  ;;  %v1149_v29 = vcombine.low %v726_v24, %v730_v25 }
  0x20   :  { %1176 = vmatpush3.bf16.msra.mxu0 %v1280_v30  ;;  %v1151_v30 = vcombine.low %v727_v26, %v731_v28 }
  0x21   :  { %1198 = vmatpush3.bf16.msra.mxu1 %v1281_v31  ;;  %1205 = vmatprep.subr.bf16.mxu0 %v1282_v40  ;;  %v1152_v31 = vcombine.high %v727_v26, %v731_v28  ;;  %v1148_v40 = vcombine.high %v721_v34, %v725_v38 }
  0x22   :  { %1227 = vmatprep.subr.bf16.mxu1 %v1283_v41 }
  0x23   :  { %589 = vmatmul.mubr.bf16.vlgmr.msra.gmra.mrb[0].mxu0 %v29_v37  ;;  %v1146_v37 = vcombine.high %v720_v32, %v724_v33 }
  0x24   :  { %629 = vmatmul.mubr.bf16.vlgmr.msra.gmra.mrb[0].mxu1 %v31_v39  ;;  %1206 = vmatpush3.bf16.msra.mxu0 %v1284_v42  ;;  %v1147_v39 = vcombine.low %v721_v34, %v725_v38 }
  0x25   :  { %1228 = vmatpush3.bf16.msra.mxu1 %v1285_v43  ;;  %1207 = vmatprep.subr.bf16.mxu0 %v1286_v44  ;;  %v1076_v43 = vld [vmem:[%s1678_s2] ss:$0 sm:$0xff] }
  0x26   :  { %1229 = vmatprep.subr.bf16.mxu1 %v1287_v45  ;;  %668 = vmatprep.mubr.bf16.mxu0 %v34_v10 }
  0x27   :  { %708 = vmatprep.mubr.bf16.mxu1 %v36_v11 }
  0x28   :  { %1208 = vmatpush3.bf16.msra.mxu0 %v1288_v46 }
  0x29   :  { %1230 = vmatpush3.bf16.msra.mxu1 %v1289_v47  ;;  %1209 = vmatprep.subr.bf16.mxu0 %v1290_v48 }
  0x2a   :  { %1231 = vmatprep.subr.bf16.mxu1 %v1291_v49 }
  0x2c   :  { %1210 = vmatpush3.bf16.msra.mxu0 %v1292_v50 }
  0x2d   :  { %1232 = vmatpush3.bf16.msra.mxu1 %v1293_v51  ;;  %1211 = vmatprep.subr.bf16.mxu0 %v1294_v52 }
  0x2e   :  { %1233 = vmatprep.subr.bf16.mxu1 %v1295_v53 }
  0x30   :  { %1212 = vmatpush3.bf16.msra.mxu0 %v1296_v54 }
  0x31   :  { %1234 = vmatpush3.bf16.msra.mxu1 %v1297_v55  ;;  %1213 = vmatprep.subr.bf16.mxu0 %v1298_v56 }
  0x32   :  { %1235 = vmatprep.subr.bf16.mxu1 %v1299_v57 }
  0x34   :  { %1214 = vmatpush3.bf16.msra.mxu0 %v1300_v58 }
  0x35   :  { %1236 = vmatpush3.bf16.msra.mxu1 %v1301_v59  ;;  %1215 = vmatprep.subr.bf16.mxu0 %v1302_v60 }
  0x36   :  { %1237 = vmatprep.subr.bf16.mxu1 %v1303_v61 }
  0x38   :  { %1216 = vmatpush3.bf16.msra.mxu0 %v1304_v62 }
  0x39   :  { %1238 = vmatpush3.bf16.msra.mxu1 %v1305_v63  ;;  %1217 = vmatprep.subr.bf16.mxu0 %v1306_v0 }
  0x3a   :  { %1239 = vmatprep.subr.bf16.mxu1 %v1307_v1 }
  0x3c   :  { %1218 = vmatpush3.bf16.msra.mxu0 %v1308_v2  ;;  %v728_v2 = vld [vmem:[%s1677_s3 + $0x50] sm:$0xff] }
  0x3d   :  { %1240 = vmatpush3.bf16.msra.mxu1 %v1309_v3  ;;  %1219 = vmatprep.subr.bf16.mxu0 %v1310_v4  ;;  %v732_v3 = vld [vmem:[%s1677_s3 + $0x70] sm:$0xff]  ;;  %v729_v4 = vld [vmem:[%s1677_s3 + $0x58] sm:$0xff] }
  0x3e   :  { %1241 = vmatprep.subr.bf16.mxu1 %v1311_v5  ;;  %v733_v5 = vld [vmem:[%s1677_s3 + $0x78] sm:$0xff]  ;;  %v1154_v8 = vcombine.high %v728_v2, %v732_v3  ;;  %v1153_v10 = vcombine.low %v728_v2, %v732_v3 }
  0x3f   :  { %v1156_v9 = vcombine.high %v729_v4, %v733_v5  ;;  %v1155_v11 = vcombine.low %v729_v4, %v733_v5 }
  0x40   :  { %1220 = vmatpush3.bf16.msra.mxu0 %v1312_v6 }
  0x41   :  { %1242 = vmatpush3.bf16.msra.mxu1 %v1313_v7  ;;  %860 = vmatprep.subr.bf16.mxu0 %v1142_v19 }
  0x42   :  { %901 = vmatprep.subr.bf16.mxu1 %v1144_v23 }
  0x43   :  { %669 = vmatmul.mubr.bf16.vlgmr.msra.gmra.mrb[4].mxu0 %v33_v14  ;;  %v738_v14 = vsub.s32 0, %v737_v13 }
  0x44   :  { %709 = vmatmul.mubr.bf16.vlgmr.msra.gmra.mrb[4].mxu1 %v35_v15  ;;  %861 = vmatpush1.bf16.msra.mxu0 %v1141_v21  ;;  %v746_v15 = vsub.s32 2, %v737_v13  ;;  %v743_v21 = vrot.slane %v734_v16, %v742_v17 }
  0x45   :  { %902 = vmatpush1.bf16.msra.mxu1 %v1143_v22  ;;  %862 = vmatprep.subr.bf16.mxu0 %v1150_v27  ;;  %v739_v19 = vrot.slane %v734_v16, %v738_v14  ;;  %v751_v22 = vrot.slane %v734_v16, %v750_v18 }
  0x46   :  { %903 = vmatprep.subr.bf16.mxu1 %v1152_v31  ;;  %892 = vmatprep.mubr.bf16.mxu0 %v1346_v35  ;;  %v747_v20 = vrot.slane %v734_v16, %v746_v15 }
  0x47   :  { %933 = vmatprep.mubr.bf16.mxu1 %v1346_v35 }
  0x48   :  { %863 = vmatpush1.bf16.msra.mxu0 %v1149_v29  ;;  %v754_v29 = vsub.s32 4, %v737_v13 }
  0x49   :  { %904 = vmatpush1.bf16.msra.mxu1 %v1151_v30  ;;  %942 = vmatprep.subr.bf16.mxu0 %v1146_v37  ;;  %v762_v30 = vsub.s32 6, %v737_v13 }
  0x4a   :  { %983 = vmatprep.subr.bf16.mxu1 %v1148_v40 }
  0xf6   :  { %v1177_v41 = vpop.f32.mrb[0].mxu0 }
  0xf7   :  { %v1199_v42 = vpop.f32.mrb[0].mxu1  ;;  %v1178_v44 = vpop.f32.mrb[1].mxu0 }
  0xf8   :  { %v1200_v45 = vpop.f32.mrb[1].mxu1  ;;  %v1179_v46 = vadd.f32 %v1178_v44, %v1177_v41  ;;  %v1180_v48 = vpop.f32.mrb[2].mxu0 }
  0xf9   :  { %v1201_v47 = vadd.f32 %v1200_v45, %v1199_v42  ;;  %v1202_v49 = vpop.f32.mrb[2].mxu1  ;;  %v1181_v50 = vpop.f32.mrb[3].mxu0  ;;  %v755_v45 = vrot.slane %v734_v16, %v754_v29 }
  0xfa   :  { %v1203_v51 = vpop.f32.mrb[3].mxu1  ;;  %v591_v52 = vadd.f32 %v1179_v46, %v1076_v43  ;;  %v763_v46 = vrot.slane %v734_v16, %v762_v30 }
  0xfc   :  { %v631_v53 = vadd.f32 %v1201_v47, %v591_v52 }
 0x116   :  { %v1221_v54 = vpop.f32.mrb[4].mxu0 }
 0x117   :  { %v1243_v55 = vpop.f32.mrb[4].mxu1  ;;  %v1222_v56 = vpop.f32.mrb[5].mxu0 }
 0x118   :  { %v1223_v57 = vadd.f32 %v1222_v56, %v1221_v54  ;;  %v1244_v58 = vpop.f32.mrb[5].mxu1  ;;  %v1224_v59 = vpop.f32.mrb[6].mxu0 }
 0x119   :  { %v1245_v60 = vadd.f32 %v1244_v58, %v1243_v55  ;;  %v1246_v61 = vpop.f32.mrb[6].mxu1  ;;  %v1225_v62 = vpop.f32.mrb[7].mxu0 }
 0x11a   :  { %v671_v63 = vadd.f32 %v1223_v57, %v631_v53  ;;  %v1247_v0 = vpop.f32.mrb[7].mxu1 }
 0x11c   :  { %v711_v1 = vadd.f32 %v1245_v60, %v671_v63 }
 0x11e   :  { %v716_v6 = vmax.f32 %v711_v1, 0.0 }
 0x120   :  { %v717_v7 = vpack.c.bf16 %v716_v6, %v716_v6 }
 0x122   :  { %1157 = vmatmul.mubr.msk.bf16.vlgmr.msra.gmra.mrb[8].mxu0 %vm856_vm0, %v717_v7  ;;  %1158 = vmatmul.mubr.msk.bf16.vlgmr.msra.gmra.mrb[8].mxu1 %vm856_vm0, %v717_v7 }
 0x123   :  { %943 = vmatpush1.bf16.msra.mxu0 %v1145_v36  ;;  %984 = vmatpush1.bf16.msra.mxu1 %v1147_v39  ;;  %v766_v36 = vsub.s32 7, %v737_v13 }
 0x124   :  { %944 = vmatprep.subr.bf16.mxu0 %v1154_v8  ;;  %985 = vmatprep.subr.bf16.mxu1 %v1156_v9 }
 0x125   :  { %974 = vmatprep.mubr.bf16.mxu0 %v1346_v35  ;;  %1015 = vmatprep.mubr.bf16.mxu1 %v1346_v35  ;;  %v758_v35 = vsub.s32 5, %v737_v13  ;;  %v767_v50 = vrot.slane %v734_v16, %v766_v36 }
 0x127   :  { %945 = vmatpush1.bf16.msra.mxu0 %v1153_v10  ;;  %986 = vmatpush1.bf16.msra.mxu1 %v1155_v11  ;;  %v759_v49 = vrot.slane %v734_v16, %v758_v35 }
 0x12a   :  { %1159 = vmatmul.mubr.msk.bf16.vlgmr.msra.gmra.mrb[12].mxu0 %vm856_vm0, %v717_v7  ;;  %1160 = vmatmul.mubr.msk.bf16.vlgmr.msra.gmra.mrb[12].mxu1 %vm856_vm0, %v717_v7 }
 0x1f5   :  { %v894_v23 = vpop.f32.mrb[8].mxu0  ;;  %v935_v24 = vpop.f32.mrb[8].mxu1 }
 0x1f6   :  { %v895_v25 = vadd.f32 %v894_v23, %v739_v19  ;;  %v936_v26 = vadd.f32 %v935_v24, %v747_v20  ;;  %v896_v27 = vpop.f32.mrb[9].mxu0  ;;  %v937_v28 = vpop.f32.mrb[9].mxu1 }
 0x1f7   :  { %v897_v31 = vadd.f32 %v896_v27, %v743_v21  ;;  %v938_v32 = vadd.f32 %v937_v28, %v751_v22  ;;  %v898_v33 = vpop.f32.mrb[10].mxu0  ;;  %v939_v34 = vpop.f32.mrb[10].mxu1 }
 0x1f8   :  { %v1024_v37 = vsub.f32 0.0, %v895_v25  ;;  %v1026_v38 = vsub.f32 0.0, %v936_v26  ;;  %v899_v39 = vpop.f32.mrb[11].mxu0  ;;  %v940_v40 = vpop.f32.mrb[11].mxu1 }
 0x1f9   :  { %v1025_v41 = vsub.f32 0.0, %v897_v31  ;;  %v1027_v42 = vsub.f32 0.0, %v938_v32 }
 0x1fa   :  { %v1032_v43 = vmul.f32 1.442695, %v1024_v37  ;;  %v1036_v44 = vmul.f32 1.442695, %v1026_v38 }
 0x1fb   :  { %v1034_v47 = vmul.f32 1.442695, %v1025_v41  ;;  %v1038_v48 = vmul.f32 1.442695, %v1027_v42 }
 0x1fc   :  { %1314 = vpow2.f32 %v1032_v43 }
 0x1fd   :  { %1316 = vpow2.f32 %v1036_v44  ;;  %v976_v51 = vpop.f32.mrb[12].mxu0  ;;  %v1017_v52 = vpop.f32.mrb[12].mxu1 }
 0x1fe   :  { %1318 = vpow2.f32 %v1034_v47  ;;  %v977_v53 = vadd.f32 %v976_v51, %v755_v45  ;;  %v1018_v54 = vadd.f32 %v1017_v52, %v763_v46  ;;  %v978_v55 = vpop.f32.mrb[13].mxu0  ;;  %v1019_v56 = vpop.f32.mrb[13].mxu1 }
 0x1ff   :  { %1320 = vpow2.f32 %v1038_v48  ;;  %v979_v57 = vadd.f32 %v978_v55, %v759_v49  ;;  %v1020_v58 = vadd.f32 %v1019_v56, %v767_v50  ;;  %v980_v59 = vpop.f32.mrb[14].mxu0  ;;  %v1021_v60 = vpop.f32.mrb[14].mxu1 }
 0x200   :  { %v1028_v61 = vsub.f32 0.0, %v977_v53  ;;  %v1030_v62 = vsub.f32 0.0, %v1018_v54  ;;  %v981_v63 = vpop.f32.mrb[15].mxu0  ;;  %v1022_v0 = vpop.f32.mrb[15].mxu1 }
 0x201   :  { %v1029_v1 = vsub.f32 0.0, %v979_v57  ;;  %v1031_v2 = vsub.f32 0.0, %v1020_v58 }
 0x202   :  { %v1040_v3 = vmul.f32 1.442695, %v1028_v61  ;;  %v1044_v4 = vmul.f32 1.442695, %v1030_v62 }
 0x203   :  { %v1042_v5 = vmul.f32 1.442695, %v1029_v1  ;;  %v1046_v6 = vmul.f32 1.442695, %v1031_v2 }
 0x204   :  { %1322 = vpow2.f32 %v1040_v3 }
 0x205   :  { %1324 = vpow2.f32 %v1044_v4 }
 0x206   :  { %v1315_v7 = vpop.eup %1314  ;;  %1326 = vpow2.f32 %v1042_v5 }
 0x207   :  { %v1317_v8 = vpop.eup %1316  ;;  %v1048_v9 = vadd.f32 1.0, %v1315_v7  ;;  %1328 = vpow2.f32 %v1046_v6 }
 0x208   :  { %v1319_v10 = vpop.eup %1318  ;;  %v1050_v11 = vadd.f32 1.0, %v1317_v8 }
 0x209   :  { %v1321_v12 = vpop.eup %1320  ;;  %1330 = vrcp.f32 %v1048_v9  ;;  %v1049_v13 = vadd.f32 1.0, %v1319_v10 }
 0x20a   :  { %1332 = vrcp.f32 %v1050_v11  ;;  %v1051_v14 = vadd.f32 1.0, %v1321_v12 }
 0x20b   :  { %1334 = vrcp.f32 %v1049_v13 }
 0x20c   :  { %1336 = vrcp.f32 %v1051_v14 }
 0x20e   :  { %v1323_v15 = vpop.eup %1322 }
 0x20f   :  { %v1325_v16 = vpop.eup %1324  ;;  %v1052_v17 = vadd.f32 1.0, %v1323_v15 }
 0x210   :  { %v1327_v18 = vpop.eup %1326  ;;  %v1054_v19 = vadd.f32 1.0, %v1325_v16 }
 0x211   :  { %v1329_v20 = vpop.eup %1328  ;;  %1338 = vrcp.f32 %v1052_v17  ;;  %v1053_v21 = vadd.f32 1.0, %v1327_v18 }
 0x212   :  { %1340 = vrcp.f32 %v1054_v19  ;;  %v1055_v22 = vadd.f32 1.0, %v1329_v20 }
 0x213   :  { %v1331_v23 = vpop.eup %1330  ;;  %1342 = vrcp.f32 %v1053_v21 }
 0x214   :  { %v1333_v24 = vpop.eup %1332  ;;  %1064 = vst [vmem:[%s1680_s5] sm:$0xff] %v1331_v23  ;;  %1344 = vrcp.f32 %v1055_v22 }
 0x215   :  { %v1335_v25 = vpop.eup %1334  ;;  %1066 = vst [vmem:[%s1680_s5 + $0x10] sm:$0xff] %v1333_v24 }
 0x216   :  { %v1337_v26 = vpop.eup %1336  ;;  %1065 = vst [vmem:[%s1680_s5 + $0x8] sm:$0xff] %v1335_v25 }
 0x217   :  { %1067 = vst [vmem:[%s1680_s5 + $0x18] sm:$0xff] %v1337_v26 }
 0x21b   :  { %v1339_v27 = vpop.eup %1338 }
 0x21c   :  { %v1341_v28 = vpop.eup %1340  ;;  %1068 = vst [vmem:[%s1680_s5 + $0x20] sm:$0xff] %v1339_v27 }
 0x21d   :  { %v1343_v29 = vpop.eup %1342  ;;  %1070 = vst [vmem:[%s1680_s5 + $0x30] sm:$0xff] %v1341_v28 }
 0x21e   :  { %v1345_v30 = vpop.eup %1344  ;;  %1069 = vst [vmem:[%s1680_s5 + $0x28] sm:$0xff] %v1343_v29 }
 0x21f   :  { %1071 = vst [vmem:[%s1680_s5 + $0x38] sm:$0xff] %v1345_v30 }

</bundles_post_ra>
